<compile_context>
chip_gen: v6e
topology: v6e:2x2x1
jax: 0.10.0
libtpu: 0.0.40
codegen_flags: <defaults>
</compile_context>

<pallas_src>
import math
import numpy as np
import jax
import jax.numpy as jnp
from jax.experimental import pallas as pl
from jax.experimental.pallas import tpu as pltpu

# ---------------- configuration (small shapes consistent with the module) -----
B = 8              # batch
IN_FEAT = 32       # ContrastiveHead in_feat   (width of x)
MID_FEAT = 64      # ContrastiveHead mid_feat  (width of feat, BatchNorm1d dim)
OUT_FEAT = 16      # ContrastiveHead out_feat
BN_EPS = 1e-5      # PyTorch BatchNorm1d default eps


# ------------------------------- Pallas kernel --------------------------------
def contrastive_head_kernel(xcat_ref, w1_ref, w2_ref, bias_ref, out_ref):
    # y = [extractor(x) + b_ext, feat[:, :overlap]]  -- single fused matmul via block W1
    y = jnp.dot(xcat_ref[...], w1_ref[...], preferred_element_type=jnp.float32)
    # bias (packed row 0) + ReLU, all in f32 on the VPU
    h = jnp.maximum(y + bias_ref[0:1, :], 0.0)
    # head = ReLU -> BatchNorm1d(eval) -> Linear, with BN folded into (w2, bias row 1)
    out_ref[...] = (jnp.dot(h, w2_ref[...], preferred_element_type=jnp.float32)
                    + bias_ref[1:2, :OUT_FEAT])


# --------------------------------- wrapper -------------------------------------
def contrastive_head_forward(feat, x, folded, overlap_feat, non_overlap_feat):
    # Static branch selection mirrors the module's __init__/forward logic;
    # the concat / slice below is cheap plain-JAX glue outside the hot kernel.
    if non_overlap_feat == 0:
        xcat = feat                                            # head(feat)
    elif overlap_feat == 0:
        xcat = x                                               # head(extractor(x))
    else:
        xcat = jnp.concatenate([x, feat[:, :overlap_feat]], axis=1)

    args = (xcat, folded['w1'], folded['w2'], folded['bias'])
    return pl.pallas_call(
        contrastive_head_kernel,
        out_shape=jax.ShapeDtypeStruct((feat.shape[0], OUT_FEAT), jnp.float32),
        in_specs=[pl.BlockSpec(memory_space=pltpu.MemorySpace.VMEM)] * len(args),
        out_specs=pl.BlockSpec(memory_space=pltpu.MemorySpace.VMEM),
    )(*args)


# --------------------------- deterministic parameters --------------------------
def build_params(overlap, seed=0):
    """Build raw PyTorch-style params and the host-folded kernel operands."""
    rng = np.random.default_rng(seed)
    overlap_feat = round(overlap * MID_FEAT)          # same `round` as the module
    non_overlap_feat = MID_FEAT - overlap_feat

    raw = {}
    if non_overlap_feat != 0:
        raw['W_ext'] = (rng.standard_normal((non_overlap_feat, IN_FEAT))
                        / math.sqrt(IN_FEAT)).astype(np.float32)
        raw['b_ext'] = (0.1 * rng.standard_normal((non_overlap_feat,))).astype(np.float32)
    raw['gamma'] = (1.0 + 0.1 * rng.standard_normal((MID_FEAT,))).astype(np.float32)
    raw['beta'] = (0.1 * rng.standard_normal((MID_FEAT,))).astype(np.float32)
    raw['mean'] = (0.1 * rng.standard_normal((MID_FEAT,))).astype(np.float32)
    raw['var'] = (0.9 + 0.1 * np.abs(rng.standard_normal((MID_FEAT,)))).astype(np.float32)
    raw['W_head'] = (rng.standard_normal((OUT_FEAT, MID_FEAT))
                     / math.sqrt(MID_FEAT)).astype(np.float32)
    raw['b_head'] = (0.1 * rng.standard_normal((OUT_FEAT,))).astype(np.float32)

    # ---- host-side constant folding of the eval-mode tail (perf feedback #1) ----
    s = raw['gamma'] / np.sqrt(raw['var'] + BN_EPS)                   # (MID,)
    shift = raw['beta'] - raw['mean'] * s                             # (MID,)
    w2 = (raw['W_head'] * s[None, :]).T.astype(np.float32)            # (MID, OUT)
    b2 = (shift @ raw['W_head'].T + raw['b_head']).astype(np.float32) # (OUT,)

    # ---- fuse extractor + concat into one block matmul (perf feedback #2) ----
    if non_overlap_feat == 0:
        w1 = np.eye(MID_FEAT, dtype=np.float32)                       # xcat = feat
        b1 = np.zeros((MID_FEAT,), np.float32)
    elif overlap_feat == 0:
        w1 = np.ascontiguousarray(raw['W_ext'].T)                     # (IN, MID)
        b1 = raw['b_ext'].copy()                                      # width == MID here
    else:
        kin = IN_FEAT + overlap_feat
        w1 = np.zeros((kin, MID_FEAT), np.float32)
        w1[:IN_FEAT, :non_overlap_feat] = raw['W_ext'].T
        w1[IN_FEAT:, non_overlap_feat:] = np.eye(overlap_feat, dtype=np.float32)
        b1 = np.concatenate([raw['b_ext'], np.zeros((overlap_feat,), np.float32)])

    # ---- pack the two tiny bias rows into a single operand (perf feedback #4) ----
    assert OUT_FEAT <= MID_FEAT
    bias_pack = np.zeros((2, MID_FEAT), np.float32)
    bias_pack[0, :] = b1
    bias_pack[1, :OUT_FEAT] = b2

    folded = dict(w1=jnp.asarray(w1), w2=jnp.asarray(w2), bias=jnp.asarray(bias_pack))
    raw = {k: jnp.asarray(v) for k, v in raw.items()}
    return raw, folded, overlap_feat, non_overlap_feat


# ------------------------------ pure-JAX reference -----------------------------
def contrastive_head_ref(feat, x, raw, overlap_feat, non_overlap_feat):
    """Unfolded math, faithful to the PyTorch forward (eval-mode BN)."""
    if non_overlap_feat == 0:
        y = feat
    elif overlap_feat == 0:
        y = x @ raw['W_ext'].T + raw['b_ext']
    else:
        y = jnp.concatenate([x @ raw['W_ext'].T + raw['b_ext'],
                             feat[:, :overlap_feat]], axis=1)
    h = jnp.maximum(y, 0.0)
    h = (h - raw['mean']) / jnp.sqrt(raw['var'] + BN_EPS) * raw['gamma'] + raw['beta']
    return h @ raw['W_head'].T + raw['b_head']


# ----------------------------------- main ---------------------------------------
if __name__ == "__main__":
    key = jax.random.PRNGKey(0)
    kf, kx = jax.random.split(key)
    feat = jax.random.normal(kf, (B, MID_FEAT), dtype=jnp.float32)
    x = jax.random.normal(kx, (B, IN_FEAT), dtype=jnp.float32)

    # Exercise all three forward branches of ContrastiveHead.
    for overlap in (0.25, 0.0, 1.0):
        raw, folded, ov, nov = build_params(overlap)
        out = contrastive_head_forward(feat, x, folded, ov, nov)
        out = jax.block_until_ready(out)
        assert out.shape == (B, OUT_FEAT), out.shape

        ref = contrastive_head_ref(feat, x, raw, ov, nov)
        np.testing.assert_allclose(np.asarray(out), np.asarray(ref),
                                   rtol=2e-4, atol=2e-4)

    print("KERNEL_OK")
</pallas_src>

<mosaic_0001>
module attributes {stable_mosaic.version = 11 : i64} {
  func.func @contrastive_head_kernel(%arg0: memref<8x48xf32, #tpu.memory_space<vmem>>, %arg1: memref<48x64xf32, #tpu.memory_space<vmem>>, %arg2: memref<64x16xf32, #tpu.memory_space<vmem>>, %arg3: memref<2x64xf32, #tpu.memory_space<vmem>>, %arg4: memref<8x16xf32, #tpu.memory_space<vmem>>) attributes {dimension_semantics = [], scalar_prefetch = 0 : i64, scratch_operands = 0 : i64, tpu.core_type = #tpu.core_type<tc>} {
    %c0 = arith.constant 0 : index
    %c0_0 = arith.constant 0 : index
    %0 = vector.load %arg0[%c0, %c0_0] : memref<8x48xf32, #tpu.memory_space<vmem>>, vector<8x48xf32>
    %c0_1 = arith.constant 0 : index
    %c0_2 = arith.constant 0 : index
    %1 = vector.load %arg1[%c0_1, %c0_2] : memref<48x64xf32, #tpu.memory_space<vmem>>, vector<48x64xf32>
    %cst = arith.constant dense<0.000000e+00> : vector<8x64xf32>
    %2 = tpu.matmul %0, %1, %cst {dimension_numbers = #tpu.dot_dimension_numbers<[1], [0], [0], [1], [0, 0, 1, 1], [], []>} : vector<8x48xf32>, vector<48x64xf32>, vector<8x64xf32> -> vector<8x64xf32>
    %c0_3 = arith.constant 0 : index
    %c0_4 = arith.constant 0 : index
    %3 = vector.load %arg3[%c0_3, %c0_4] : memref<2x64xf32, #tpu.memory_space<vmem>>, vector<1x64xf32>
    %4 = vector.broadcast %3 : vector<1x64xf32> to vector<8x64xf32>
    %5 = arith.addf %2, %4 : vector<8x64xf32>
    %cst_5 = arith.constant 0.000000e+00 : f32
    %6 = vector.broadcast %cst_5 : f32 to vector<8x64xf32>
    %7 = arith.maximumf %5, %6 : vector<8x64xf32>
    %c0_6 = arith.constant 0 : index
    %c0_7 = arith.constant 0 : index
    %8 = vector.load %arg2[%c0_6, %c0_7] : memref<64x16xf32, #tpu.memory_space<vmem>>, vector<64x16xf32>
    %cst_8 = arith.constant dense<0.000000e+00> : vector<8x16xf32>
    %9 = tpu.matmul %7, %8, %cst_8 {dimension_numbers = #tpu.dot_dimension_numbers<[1], [0], [0], [1], [0, 0, 1, 1], [], []>} : vector<8x64xf32>, vector<64x16xf32>, vector<8x16xf32> -> vector<8x16xf32>
    %c1 = arith.constant 1 : index
    %c0_9 = arith.constant 0 : index
    %10 = vector.load %arg3[%c1, %c0_9] : memref<2x64xf32, #tpu.memory_space<vmem>>, vector<1x16xf32>
    %11 = vector.broadcast %10 : vector<1x16xf32> to vector<8x16xf32>
    %12 = arith.addf %9, %11 : vector<8x16xf32>
    %c0_10 = arith.constant 0 : index
    %c0_11 = arith.constant 0 : index
    %13 = vector.load %arg4[%c0_10, %c0_11] : memref<8x16xf32, #tpu.memory_space<vmem>>, vector<8x16xf32>
    tpu.vector_store %arg4[%c0_10, %c0_11], %12 {strides = array<i32>} : memref<8x16xf32, #tpu.memory_space<vmem>>, vector<8x16xf32>,
    return
  }
}

</mosaic_0001>

<bundles_post_ra>
// kernel: tpu_custom_call.1
= control target key start
LH: loop header
LB: loop body
LE: loop exit
PB: predicated region body
PF: predicated region fallthrough
CT: control target
= control target key end

     0   :  { %v287_v1 = vmov 0.0   ;;  %vm288_vm0 = vmmov 0   ;;  %s371_s0 = inlined_call_operand.vmem [shape: f32[8,48], index: 0, kind: input, shape index: {}]   ;;  %s372_s1 = inlined_call_operand.vmem [shape: f32[48,64], index: 1, kind: input, shape index: {}]   ;;  %s373_s2 = inlined_call_operand.vmem [shape: f32[64,16], index: 2, kind: input, shape index: {}]   ;;  %s374_s3 = inlined_call_operand.vmem [shape: f32[2,64], index: 3, kind: input, shape index: {}]   ;;  %s375_s4 = inlined_call_operand.hbm [shape: f32[8,16], index: 4, kind: output, shape index: {}]  }
   0x1   :  { %v24_v0 = vld [vmem:[%s372_s1 + $0x28] sm:$0xff]  ;;  %228 = vmatprep.subr.mxu0 %v287_v1  ;;  %v23_v2 = vld [vmem:[%s372_s1 + $0x20] sm:$0xff]  ;;  %240 = vmatprep.mubr.msk.f32.mxu0 %vm288_vm0, %v287_v1  ;;  %v112_v3 = vld [vmem:[%s373_s2 + $0x38] sm:$0xff] }
   0x2   :  { %229 = vmatpush3.msra.mxu0 %v24_v0  ;;  %243 = vmatprep.subr.mxu1 %v287_v1  ;;  %v111_v4 = vld [vmem:[%s373_s2 + $0x30] sm:$0xff]  ;;  %v22_v5 = vld [vmem:[%s372_s1 + $0x18] sm:$0xff]  ;;  %v110_v6 = vld [vmem:[%s373_s2 + $0x28] sm:$0xff] }
   0x3   :  { %230 = vmatprep.subr.mxu0 %v287_v1  ;;  %244 = vmatpush3.msra.mxu1 %v112_v3 }
   0x4   :  { %231 = vmatpush3.msra.mxu0 %v23_v2  ;;  %245 = vmatprep.subr.mxu1 %v287_v1 }
   0x5   :  { %9 = vsyncpa [#allocation3], 0  ;;  %232 = vmatprep.subr.mxu0 %v287_v1  ;;  %v21_v7 = vld [vmem:[%s372_s1 + $0x10] sm:$0xff]  ;;  %246 = vmatpush3.msra.mxu1 %v111_v4  ;;  %v109_v8 = vld [vmem:[%s373_s2 + $0x20] sm:$0xff]  ;;  %vm30_vm1 = vcmask 392192   ;;  %vm118_vm2 = vcmask 523264  }
   0x6   :  { %233 = vmatpush3.msra.mxu0 %v22_v5  ;;  %247 = vmatprep.subr.mxu1 %v287_v1  ;;  %v20_v9 = vld [vmem:[%s372_s1 + $0x8] sm:$0xff]  ;;  %v108_v10 = vld [vmem:[%s373_s2 + $0x18] sm:$0xff]  ;;  %v19_v11 = vld [vmem:[%s372_s1] sm:$0xff]  ;;  %s289_s21 = smov [#allocation2]   ;;  %vm192_vm3 = vcmask 130048  }
   0x7   :  { %234 = vmatprep.subr.mxu0 %v287_v1  ;;  %248 = vmatpush3.msra.mxu1 %v110_v6  ;;  %v18_v12 = vld [vmem:[%s371_s0] sm:$0xff]  ;;  %v107_v13 = vld [vmem:[%s373_s2 + $0x10] sm:$0xff]  ;;  %v106_v14 = vld [vmem:[%s373_s2 + $0x8] sm:$0xff]  ;;  %s200_s22 = sshll.u32 %s289_s21, 4  ;;  %s201_s22 = int_to_ptr.vmem [resolvable:$true] %s200_s22 }
   0x8   :  { %235 = vmatpush3.msra.mxu0 %v21_v7  ;;  %249 = vmatprep.subr.mxu1 %v287_v1  ;;  %v105_v15 = vld [vmem:[%s373_s2] sm:$0xff]  ;;  %s265_s2 = scalar_lea.vmem %s201_s22, 128  ;;  %p270_p1 = scmp.lt.s32.totalorder %s201_s22, %s201_s22 }
   0x9   :  { %236 = vmatprep.subr.mxu0 %v287_v1  ;;  %250 = vmatpush3.msra.mxu1 %v109_v8  ;;  %v208_v16 = vld [vmem:[%s374_s3] ss:$0 sm:$0xff]  ;;  %v210_v21 = vld [vmem:[%s374_s3 + $0x1] ss:$0 sm:$0xff]  ;;  %p266_p0 = scmp.ne.s32.totalorder %s201_s22, %s265_s2  ;;  %p271_p2 = scmp.lt.s32.totalorder %s265_s2, %s265_s2 }
   0xa   :  { %237 = vmatpush3.msra.mxu0 %v20_v9  ;;  %251 = vmatprep.subr.mxu1 %v287_v1 }
   0xb   :  { %238 = vmatprep.subr.mxu0 %v287_v1  ;;  %252 = vmatpush3.msra.mxu1 %v108_v10  ;;  %p272_p3 = por %p271_p2, %p270_p1 }
   0xc   :  { %239 = vmatpush3.msra.mxu0 %v19_v11  ;;  %253 = vmatprep.subr.mxu1 %v287_v1 }
   0xd   :  { %241 = vmatmul.mubr.msk.f32.vlgmr.msra.gmra.mxu0 %vm30_vm1, %v18_v12  ;;  %259 = vmatprep.mubr.msk.f32.mxu1 %vm288_vm0, %v287_v1  ;;  %p273_p4 = pnand %p272_p3, %p266_p0 }
   0xe   :  { %254 = vmatpush3.msra.mxu1 %v107_v13 }
   0xf   :  { %255 = vmatprep.subr.mxu1 %v287_v1 }
  0x10   :  { %256 = vmatpush3.msra.mxu1 %v106_v14 }
  0x11   :  { %257 = vmatprep.subr.mxu1 %v287_v1 }
  0x12   :  { %258 = vmatpush3.msra.mxu1 %v105_v15 }
  0xcd   :  { %v100_v17 = vpop.f32.mrf.mxu0 }
  0xce   :  { %v101_v18 = vadd.f32 %v208_v16, %v100_v17 }
  0xcf   :  { %v242_v19 = vpop.f32.mrf.mxu0 }
  0xd0   :  { %v104_v20 = vmax.f32 %v101_v18, 0.0 }
  0xd2   :  { %260 = vmatmul.mubr.msk.f32.vlgmr.msra.gmra.mxu1 %vm118_vm2, %v104_v20 }
 0x192   :  { %v188_v22 = vpop.f32.mrf.mxu1 }
 0x193   :  { %v189_v23 = vadd.f32 %v210_v21, %v188_v22 }
 0x194   :  { %v261_v24 = vpop.f32.mrf.mxu1 }
 0x195   :  { %193 = vst.msk [vmem:[#allocation2] sm:$0xff] %vm192_vm3, %v189_v23 }
 0x196   :  { %276 = shalt.err (!%p273_p4)
}
 0x197   :  { %203 = dma.vmem_to_hbm [thread:$0]  %s201_s22, 128, %s375_s4, [#allocation3]  }
 0x198   :  { %285 = dma.done.wait [#allocation3], 128  }
 0x199   :  { %286 = vsyncadd [#allocation3], 4294967168 }
 0x19a   :  { %207 = vsyncpa [#allocation3], 1 }

</bundles_post_ra>
